<compile_context>
chip_gen: v7x
topology: tpu7x:2x2x1
jax: 0.10.0
libtpu: 0.0.40
codegen_flags: <defaults>
</compile_context>

<pallas_src>
import functools

import jax
import jax.numpy as jnp
from jax.experimental import pallas as pl
from jax.experimental.pallas import tpu as pltpu

EPS = 1e-5          # PyTorch BatchNorm1d default
LANE = 128


def _round_up(n, m):
    return ((n + m - 1) // m) * m


def _vmem_budget_bytes():
    """Generation-aware scoped-VMEM budget (~96 MiB v5e/v6e, ~48 MiB v7x)."""
    cap = 64 * 1024 * 1024
    try:
        cap = int(getattr(pltpu.get_tpu_info(), "vmem_capacity_bytes", cap))
    except Exception:
        pass
    return max(16 * 1024 * 1024, min(cap * 3 // 4, 100 * 1024 * 1024))


# --------------------------------------------------------------------------
# Fast path: whole problem resident in VMEM, single grid step.
# --------------------------------------------------------------------------
def _make_fast_kernel(B):
    inv_b = 1.0 / float(B)

    def kernel(x_ref,                       # (B, L)      f32
               g1_ref, b1_ref,              # (1, L)      f32  BN1 affine
               w1_ref,                      # (L, H_pad)  bf16 Linear(L,H) weight^T (zero-padded)
               c1_ref,                      # (1, H_pad)  f32  Linear(L,H) bias
               g2_ref, b2_ref,              # (1, H_pad)  f32  BN2 affine
               w2_ref,                      # (1, H_pad)  f32  Linear(H,1) weight as a lane row
               c2_ref,                      # (1, 1)      f32  Linear(H,1) bias
               o_ref):                      # (1, B)      f32  lane-dense output
        x = x_ref[...]
        mu1 = jnp.sum(x, axis=0, keepdims=True) * inv_b
        var1 = jnp.sum(x * x, axis=0, keepdims=True) * inv_b - mu1 * mu1
        s1 = jax.lax.rsqrt(var1 + EPS) * g1_ref[...]
        t1 = b1_ref[...] - mu1 * s1
        xn = x * s1 + t1                                           # BN1, folded (2 ops/elt)
        h = jnp.dot(xn.astype(w1_ref.dtype), w1_ref[...],
                    preferred_element_type=jnp.float32) + c1_ref[...]
        mu2 = jnp.sum(h, axis=0, keepdims=True) * inv_b
        var2 = jnp.sum(h * h, axis=0, keepdims=True) * inv_b - mu2 * mu2
        scale2 = jax.lax.rsqrt(var2 + EPS) * g2_ref[...]
        w2 = w2_ref[...]
        # BN2 + Linear(H,1) folded:  out = (w2*scale2) . h^T + (c2 + w2 . (b2 - mu2*scale2))
        w2e = w2 * scale2
        const = c2_ref[...] + jnp.sum(w2 * (b2_ref[...] - mu2 * scale2),
                                      axis=1, keepdims=True)
        out = jax.lax.dot_general(w2e, h, (((1,), (1,)), ((), ())),
                                  preferred_element_type=jnp.float32) + const
        o_ref[...] = out.astype(o_ref.dtype)

    return kernel


# --------------------------------------------------------------------------
# Tiled two-phase path: (phase, B-tile) grid, for very large B.
# --------------------------------------------------------------------------
def _make_tiled_kernel(B, tile_b, n_tiles, H_pad):
    inv_b = 1.0 / float(B)
    last = n_tiles - 1
    ragged = (n_tiles * tile_b) != B       # last x tile has out-of-bounds (garbage) rows

    def kernel(x_ref,                       # (tile_b, L)     f32  current x tile
               g1_ref, b1_ref,              # (1, L)          f32
               w1_ref,                      # (L, H_pad)      bf16
               c1_ref,                      # (1, H_pad)      f32
               g2_ref, b2_ref,              # (1, H_pad)      f32
               w2_ref,                      # (1, H_pad)      f32
               c2_ref,                      # (1, 1)          f32
               o_ref,                       # (1, B_pad)      f32  resident output row
               xs_ref, xq_ref,              # (1, L)   f32  x sum/sumsq -> (t1, s1)
               hs_ref, hq_ref,              # (1, H_pad) f32  h sum/sumsq
               hbuf_ref):                   # (B_pad, H_pad) bf16  stashed h
        phase = pl.program_id(0)
        t = pl.program_id(1)

        def row_mask():
            row = jax.lax.broadcasted_iota(jnp.int32, (tile_b, 1), 0) + t * tile_b
            return row < B

        # ---- init accumulators (first grid step only) ----
        @pl.when(jnp.logical_and(phase == 0, t == 0))
        def _():
            xs_ref[...] = jnp.zeros_like(xs_ref)
            xq_ref[...] = jnp.zeros_like(xq_ref)
            hs_ref[...] = jnp.zeros_like(hs_ref)
            hq_ref[...] = jnp.zeros_like(hq_ref)

        # ---- phase 0: single-pass x statistics (mask only the ragged last tile) ----
        def acc_x(x):
            xs_ref[...] += jnp.sum(x, axis=0, keepdims=True)
            xq_ref[...] += jnp.sum(x * x, axis=0, keepdims=True)

        if ragged:
            @pl.when(jnp.logical_and(phase == 0, t != last))
            def _():
                acc_x(x_ref[...])

            @pl.when(jnp.logical_and(phase == 0, t == last))
            def _():
                acc_x(jnp.where(row_mask(), x_ref[...], 0.0))
        else:
            @pl.when(phase == 0)
            def _():
                acc_x(x_ref[...])

        # ---- phase-0 finalize: fold BN1 into (s1, t1) ----
        @pl.when(jnp.logical_and(phase == 0, t == last))
        def _():
            mu1 = xs_ref[...] * inv_b
            var1 = xq_ref[...] * inv_b - mu1 * mu1                 # biased variance
            s1 = jax.lax.rsqrt(var1 + EPS) * g1_ref[...]
            xq_ref[...] = s1
            xs_ref[...] = b1_ref[...] - mu1 * s1

        # ---- phase 1: BN1 -> Linear(L,H) -> f32 h stats -> bf16 stash ----
        @pl.when(phase == 1)
        def _():
            xn = x_ref[...] * xq_ref[...] + xs_ref[...]            # folded BN1
            h = jnp.dot(xn.astype(w1_ref.dtype), w1_ref[...],
                        preferred_element_type=jnp.float32) + c1_ref[...]

            def acc_h(hm):
                hs_ref[...] += jnp.sum(hm, axis=0, keepdims=True)
                hq_ref[...] += jnp.sum(hm * hm, axis=0, keepdims=True)

            if ragged:
                @pl.when(t != last)
                def _():
                    acc_h(h)

                @pl.when(t == last)
                def _():
                    acc_h(jnp.where(row_mask(), h, 0.0))
            else:
                acc_h(h)

            start = pl.multiple_of(t * tile_b, tile_b)
            hbuf_ref[pl.ds(start, tile_b), :] = h.astype(hbuf_ref.dtype)

        # ---- epilogue: folded BN2 + Linear(H,1) — ONE matmul, ONE lane-dense store ----
        @pl.when(jnp.logical_and(phase == 1, t == last))
        def _():
            mu2 = hs_ref[...] * inv_b
            var2 = hq_ref[...] * inv_b - mu2 * mu2
            scale2 = jax.lax.rsqrt(var2 + EPS) * g2_ref[...]
            w2 = w2_ref[...]
            w2e = (w2 * scale2).astype(hbuf_ref.dtype)
            const = c2_ref[...] + jnp.sum(w2 * (b2_ref[...] - mu2 * scale2),
                                          axis=1, keepdims=True)
            out = jax.lax.dot_general(w2e, hbuf_ref[...], (((1,), (1,)), ((), ())),
                                      preferred_element_type=jnp.float32) + const
            o_ref[...] = out.astype(o_ref.dtype)

    return kernel


# --------------------------------------------------------------------------
# Parameter preparation (PyTorch layout -> kernel layout) and wrapper.
# --------------------------------------------------------------------------
def prepare_params(torch_params, H_pad):
    """Pad / transpose / cast PyTorch-layout parameters to the kernel layout."""
    g1, b1, w1, c1, g2, b2, w2, c2 = torch_params
    L = g1.shape[0]
    H = w1.shape[0]
    f32 = jnp.float32

    g1k = g1.reshape(1, L).astype(f32)
    b1k = b1.reshape(1, L).astype(f32)

    # Linear(L,H): PyTorch weight (H, L) -> (L, H), zero-pad H -> H_pad so padded
    # output lanes stay exactly zero downstream; bf16 for the MXU.
    w1k = jnp.zeros((L, H_pad), dtype=f32).at[:, :H].set(w1.T.astype(f32))
    w1k = w1k.astype(jnp.bfloat16)
    c1k = jnp.zeros((1, H_pad), dtype=f32).at[:, :H].set(c1.reshape(1, H).astype(f32))

    # BatchNorm1d(H): pad gamma with 1, beta with 0 (padded h columns are exactly 0).
    g2k = jnp.ones((1, H_pad), dtype=f32).at[:, :H].set(g2.reshape(1, H).astype(f32))
    b2k = jnp.zeros((1, H_pad), dtype=f32).at[:, :H].set(b2.reshape(1, H).astype(f32))

    # Linear(H,1): PyTorch weight (1, H) kept as a zero-padded (1, H_pad) lane row.
    w2k = jnp.zeros((1, H_pad), dtype=f32).at[:, :H].set(w2.reshape(1, H).astype(f32))
    c2k = c2.reshape(1, 1).astype(f32)
    return (g1k, b1k, w1k, c1k, g2k, b2k, w2k, c2k)


def _forward_impl(x, kernel_params, tile_b_override, force_tiled):
    B, L = x.shape
    g1k, b1k, w1k, c1k, g2k, b2k, w2k, c2k = kernel_params
    H_pad = w1k.shape[1]
    x = x.astype(jnp.float32)
    params = (g1k, b1k, w1k, c1k, g2k, b2k, w2k, c2k)
    budget = _vmem_budget_bytes()

    # ---------------- fast path: single grid step, x fully resident ----------------
    # Rough working set: x f32 + xn bf16 + h f32 (+ temporaries) + W1 + small params.
    fast_bytes = (B * (L * 6 + H_pad * 10) + L * H_pad * 2
                  + (4 * L + 6 * H_pad) * 4 + (1 << 20))
    if (not force_tiled) and fast_bytes <= budget // 2:
        full = lambda shape: pl.BlockSpec(shape, lambda i: (0, 0))
        out_row = pl.pallas_call(
            _make_fast_kernel(B),
            out_shape=jax.ShapeDtypeStruct((1, B), jnp.float32),
            grid_spec=pltpu.PrefetchScalarGridSpec(
                num_scalar_prefetch=0,
                grid=(1,),
                in_specs=[
                    full((B, L)),
                    full((1, L)), full((1, L)),
                    full((L, H_pad)), full((1, H_pad)),
                    full((1, H_pad)), full((1, H_pad)),
                    full((1, H_pad)), full((1, 1)),
                ],
                out_specs=pl.BlockSpec((1, B), lambda i: (0, 0)),
            ),
            compiler_params=pltpu.CompilerParams(
                dimension_semantics=("arbitrary",),
                vmem_limit_bytes=budget,
            ),
        )(x, *params)
        return out_row[0, :].reshape(B, 1)

    # ---------------- tiled two-phase path (very large B) ----------------
    tile_cap = 2048
    per_row = 2 * L * 4 + L * 2 + H_pad * 6            # x dbuf f32 + xn bf16 + h f32/bf16
    small = 2 * L * H_pad * 2 + (8 * L + 16 * H_pad) * 4 + (2 << 20)
    if tile_b_override is not None:
        tile_b = int(tile_b_override)
    else:
        hbuf_max = _round_up(B, tile_cap) * H_pad * 2
        out_max = 2 * _round_up(B, tile_cap) * 4
        avail = budget - small - hbuf_max - out_max
        tile_b = (avail // per_row) // 32 * 32 if avail > 0 else 0
        tile_b = max(32, min(tile_cap, tile_b, _round_up(B, 32)))
    n_tiles = -(-B // tile_b)
    B_pad = n_tiles * tile_b
    need = tile_b * per_row + B_pad * H_pad * 2 + 2 * B_pad * 4 + small
    if need > budget:
        # TODO(synk): spill the h stash to HBM (pl.ANY + manual DMA) for batches
        # beyond what the scoped VMEM budget can hold.
        raise ValueError(
            f"EntityColor tiled kernel: batch {B} needs ~{need >> 20} MiB VMEM "
            f"(scoped budget {budget >> 20} MiB)")

    const = lambda shape: pl.BlockSpec(shape, lambda p, t: (0, 0))
    out_row = pl.pallas_call(
        _make_tiled_kernel(B, tile_b, n_tiles, H_pad),
        out_shape=jax.ShapeDtypeStruct((1, B_pad), jnp.float32),
        grid_spec=pltpu.PrefetchScalarGridSpec(
            num_scalar_prefetch=0,
            grid=(2, n_tiles),                               # (phase, B-tile)
            in_specs=[
                pl.BlockSpec((tile_b, L), lambda p, t: (t, 0)),   # x, re-streamed per phase
                const((1, L)), const((1, L)),                     # BN1 gamma / beta
                const((L, H_pad)),                                # W1^T (bf16)
                const((1, H_pad)),                                # Linear1 bias
                const((1, H_pad)), const((1, H_pad)),             # BN2 gamma / beta
                const((1, H_pad)),                                # W2 lane row
                const((1, 1)),                                    # Linear2 bias
            ],
            out_specs=pl.BlockSpec((1, B_pad), lambda p, t: (0, 0)),
            scratch_shapes=[
                pltpu.VMEM((1, L), jnp.float32),                  # x sum   -> t1
                pltpu.VMEM((1, L), jnp.float32),                  # x sumsq -> s1
                pltpu.VMEM((1, H_pad), jnp.float32),              # h sum
                pltpu.VMEM((1, H_pad), jnp.float32),              # h sumsq
                pltpu.VMEM((B_pad, H_pad), jnp.bfloat16),         # bf16 h stash
            ],
        ),
        compiler_params=pltpu.CompilerParams(
            # Both axes sequential: phase order matters and every tile feeds the
            # shared batch-statistic accumulators.
            # TODO(synk): on v7x the B-tile axis could be split across the 2
            # TensorCores with a CMEM/VMEM_SHARED stat reduction; not worth it at
            # the batch sizes this module sees.
            dimension_semantics=("arbitrary", "arbitrary"),
            vmem_limit_bytes=budget,
        ),
    )(x, *params)
    return out_row[0, :B].reshape(B, 1)


@functools.partial(jax.jit, static_argnames=("tile_b_override", "force_tiled"))
def entity_color_forward(x, kernel_params, tile_b_override=None, force_tiled=False):
    """x: (B, L) flattened encoder features. Returns (B, 1) float32."""
    return _forward_impl(x, kernel_params, tile_b_override, force_tiled)


# --------------------------------------------------------------------------
# Pure-JAX reference and deterministic parameter init.
# --------------------------------------------------------------------------
def entity_color_reference(x, torch_params):
    """Mirrors the kernel's mixed precision (bf16 MXU operands for Linear(L,H))."""
    g1, b1, w1, c1, g2, b2, w2, c2 = torch_params
    x = x.astype(jnp.float32)
    mu1 = jnp.mean(x, axis=0, keepdims=True)
    var1 = jnp.mean(x * x, axis=0, keepdims=True) - mu1 * mu1
    xn = (x - mu1) * jax.lax.rsqrt(var1 + EPS) * g1[None, :] + b1[None, :]
    h = jnp.dot(xn.astype(jnp.bfloat16), w1.T.astype(jnp.bfloat16),
                preferred_element_type=jnp.float32) + c1[None, :]
    mu2 = jnp.mean(h, axis=0, keepdims=True)
    var2 = jnp.mean(h * h, axis=0, keepdims=True) - mu2 * mu2
    hn = (h - mu2) * jax.lax.rsqrt(var2 + EPS) * g2[None, :] + b2[None, :]
    return jnp.dot(hn, w2.T) + c2[None, :]


def init_params(key, L, H):
    """Deterministic PyTorch-layout parameter init (shapes match EntityColor.__init__)."""
    k1, k2, k3, k4, k5, k6, k7, k8 = jax.random.split(key, 8)
    f32 = jnp.float32
    g1 = (1.0 + 0.1 * jax.random.normal(k1, (L,))).astype(f32)
    b1 = (0.1 * jax.random.normal(k2, (L,))).astype(f32)
    bound1 = 1.0 / float(L) ** 0.5
    w1 = jax.random.uniform(k3, (H, L), minval=-bound1, maxval=bound1).astype(f32)
    c1 = jax.random.uniform(k4, (H,), minval=-bound1, maxval=bound1).astype(f32)
    g2 = (1.0 + 0.1 * jax.random.normal(k5, (H,))).astype(f32)
    b2 = (0.1 * jax.random.normal(k6, (H,))).astype(f32)
    bound2 = 1.0 / float(H) ** 0.5
    w2 = jax.random.uniform(k7, (1, H), minval=-bound2, maxval=bound2).astype(f32)
    c2 = jax.random.uniform(k8, (1,), minval=-bound2, maxval=bound2).astype(f32)
    return (g1, b1, w1, c1, g2, b2, w2, c2)


if __name__ == "__main__":
    # Shapes consistent with the module: latent_space_size=128, hidden_layer_size=32.
    B, L, H = 8, 128, 32
    key = jax.random.PRNGKey(0)
    kx, kp, kx2 = jax.random.split(key, 3)

    # TODO(synk): the external `encoder` passed to EntityColor.forward is not part of
    # this module; synthetic flattened encoder features stand in for its output here.
    x = jax.random.normal(kx, (B, L), dtype=jnp.float32)
    torch_params = init_params(kp, L, H)

    H_pad = _round_up(H, LANE)
    kernel_params = prepare_params(torch_params, H_pad)

    # --- fast path (the module's actual regime) ---
    out = jax.block_until_ready(entity_color_forward(x, kernel_params))
    ref = entity_color_reference(x, torch_params)
    assert out.shape == (B, 1) and out.dtype == jnp.float32
    assert bool(jnp.all(jnp.isfinite(out)))
    assert bool(jnp.allclose(out, ref, atol=1e-2, rtol=1e-2)), (
        f"fast path max abs err {float(jnp.max(jnp.abs(out - ref)))}")

    # --- tiled two-phase path, forced at a small ragged size to exercise it ---
    B2 = 40
    x2 = jax.random.normal(kx2, (B2, L), dtype=jnp.float32)
    out2 = jax.block_until_ready(
        entity_color_forward(x2, kernel_params, tile_b_override=16, force_tiled=True))
    ref2 = entity_color_reference(x2, torch_params)
    assert out2.shape == (B2, 1)
    assert bool(jnp.all(jnp.isfinite(out2)))
    # Slightly looser tolerance: the tiled path stashes h in bf16 before the folded
    # BN2+Linear(H,1) epilogue matmul.
    assert bool(jnp.allclose(out2, ref2, atol=3e-2, rtol=3e-2)), (
        f"tiled path max abs err {float(jnp.max(jnp.abs(out2 - ref2)))}")

    print("KERNEL_OK")
</pallas_src>

<mosaic_0001>
module attributes {stable_mosaic.version = 11 : i64} {
  func.func @kernel(%arg0: i32, %arg1: memref<8x128xf32, #tpu.memory_space<vmem>>, %arg2: memref<1x128xf32, #tpu.memory_space<vmem>>, %arg3: memref<1x128xf32, #tpu.memory_space<vmem>>, %arg4: memref<128x128xbf16, #tpu.memory_space<vmem>>, %arg5: memref<1x128xf32, #tpu.memory_space<vmem>>, %arg6: memref<1x128xf32, #tpu.memory_space<vmem>>, %arg7: memref<1x128xf32, #tpu.memory_space<vmem>>, %arg8: memref<1x128xf32, #tpu.memory_space<vmem>>, %arg9: memref<1x1xf32, #tpu.memory_space<vmem>>, %arg10: memref<1x8xf32, #tpu.memory_space<vmem>>) attributes {dimension_semantics = [#tpu.dimension_semantics<arbitrary>], iteration_bounds = array<i64: 1>, scalar_prefetch = 0 : i64, scratch_operands = 0 : i64, tpu.core_type = #tpu.core_type<tc>, window_params = [{pipeline_mode = #tpu.pipeline_mode<synchronous>, transform_indices = @transform_0, window_bounds = array<i64: 8, 128>}, {pipeline_mode = #tpu.pipeline_mode<synchronous>, transform_indices = @transform_1, window_bounds = array<i64: 1, 128>}, {pipeline_mode = #tpu.pipeline_mode<synchronous>, transform_indices = @transform_2, window_bounds = array<i64: 1, 128>}, {pipeline_mode = #tpu.pipeline_mode<synchronous>, transform_indices = @transform_3, window_bounds = array<i64: 128, 128>}, {pipeline_mode = #tpu.pipeline_mode<synchronous>, transform_indices = @transform_4, window_bounds = array<i64: 1, 128>}, {pipeline_mode = #tpu.pipeline_mode<synchronous>, transform_indices = @transform_5, window_bounds = array<i64: 1, 128>}, {pipeline_mode = #tpu.pipeline_mode<synchronous>, transform_indices = @transform_6, window_bounds = array<i64: 1, 128>}, {pipeline_mode = #tpu.pipeline_mode<synchronous>, transform_indices = @transform_7, window_bounds = array<i64: 1, 128>}, {pipeline_mode = #tpu.pipeline_mode<synchronous>, transform_indices = @transform_8, window_bounds = array<i64: 1, 1>}, {pipeline_mode = #tpu.pipeline_mode<synchronous>, transform_indices = @transform_9, window_bounds = array<i64: 1, 8>}]} {
    %c0 = arith.constant 0 : index
    %c0_0 = arith.constant 0 : index
    %0 = vector.load %arg1[%c0, %c0_0] : memref<8x128xf32, #tpu.memory_space<vmem>>, vector<8x128xf32>
    %cst = arith.constant dense<0.000000e+00> : vector<128xf32>
    %1 = vector.multi_reduction <add>, %0, %cst [0] : vector<8x128xf32> to vector<128xf32>
    %2 = vector.shape_cast %1 : vector<128xf32> to vector<1x128xf32>
    %cst_1 = arith.constant 1.250000e-01 : f32
    %3 = vector.broadcast %cst_1 : f32 to vector<1x128xf32>
    %4 = arith.mulf %2, %3 : vector<1x128xf32>
    %5 = arith.mulf %0, %0 : vector<8x128xf32>
    %cst_2 = arith.constant dense<0.000000e+00> : vector<128xf32>
    %6 = vector.multi_reduction <add>, %5, %cst_2 [0] : vector<8x128xf32> to vector<128xf32>
    %7 = vector.shape_cast %6 : vector<128xf32> to vector<1x128xf32>
    %cst_3 = arith.constant 1.250000e-01 : f32
    %8 = vector.broadcast %cst_3 : f32 to vector<1x128xf32>
    %9 = arith.mulf %7, %8 : vector<1x128xf32>
    %10 = arith.mulf %4, %4 : vector<1x128xf32>
    %11 = arith.subf %9, %10 : vector<1x128xf32>
    %cst_4 = arith.constant 9.99999974E-6 : f32
    %12 = vector.broadcast %cst_4 : f32 to vector<1x128xf32>
    %13 = arith.addf %11, %12 : vector<1x128xf32>
    %14 = math.rsqrt %13 : vector<1x128xf32>
    %c0_5 = arith.constant 0 : index
    %c0_6 = arith.constant 0 : index
    %15 = vector.load %arg2[%c0_5, %c0_6] : memref<1x128xf32, #tpu.memory_space<vmem>>, vector<1x128xf32>
    %16 = arith.mulf %14, %15 : vector<1x128xf32>
    %c0_7 = arith.constant 0 : index
    %c0_8 = arith.constant 0 : index
    %17 = vector.load %arg3[%c0_7, %c0_8] : memref<1x128xf32, #tpu.memory_space<vmem>>, vector<1x128xf32>
    %18 = arith.mulf %4, %16 : vector<1x128xf32>
    %19 = arith.subf %17, %18 : vector<1x128xf32>
    %20 = vector.broadcast %16 : vector<1x128xf32> to vector<8x128xf32>
    %21 = arith.mulf %0, %20 : vector<8x128xf32>
    %22 = vector.broadcast %19 : vector<1x128xf32> to vector<8x128xf32>
    %23 = arith.addf %21, %22 : vector<8x128xf32>
    %24 = arith.truncf %23 : vector<8x128xf32> to vector<8x128xbf16>
    %c0_9 = arith.constant 0 : index
    %c0_10 = arith.constant 0 : index
    %25 = vector.load %arg4[%c0_9, %c0_10] : memref<128x128xbf16, #tpu.memory_space<vmem>>, vector<128x128xbf16>
    %cst_11 = arith.constant dense<0.000000e+00> : vector<8x128xf32>
    %26 = tpu.matmul %24, %25, %cst_11 {dimension_numbers = #tpu.dot_dimension_numbers<[1], [0], [0], [1], [0, 0, 1, 1], [], []>} : vector<8x128xbf16>, vector<128x128xbf16>, vector<8x128xf32> -> vector<8x128xf32>
    %c0_12 = arith.constant 0 : index
    %c0_13 = arith.constant 0 : index
    %27 = vector.load %arg5[%c0_12, %c0_13] : memref<1x128xf32, #tpu.memory_space<vmem>>, vector<1x128xf32>
    %28 = vector.broadcast %27 : vector<1x128xf32> to vector<8x128xf32>
    %29 = arith.addf %26, %28 : vector<8x128xf32>
    %cst_14 = arith.constant dense<0.000000e+00> : vector<128xf32>
    %30 = vector.multi_reduction <add>, %29, %cst_14 [0] : vector<8x128xf32> to vector<128xf32>
    %31 = vector.shape_cast %30 : vector<128xf32> to vector<1x128xf32>
    %cst_15 = arith.constant 1.250000e-01 : f32
    %32 = vector.broadcast %cst_15 : f32 to vector<1x128xf32>
    %33 = arith.mulf %31, %32 : vector<1x128xf32>
    %34 = arith.mulf %29, %29 : vector<8x128xf32>
    %cst_16 = arith.constant dense<0.000000e+00> : vector<128xf32>
    %35 = vector.multi_reduction <add>, %34, %cst_16 [0] : vector<8x128xf32> to vector<128xf32>
    %36 = vector.shape_cast %35 : vector<128xf32> to vector<1x128xf32>
    %cst_17 = arith.constant 1.250000e-01 : f32
    %37 = vector.broadcast %cst_17 : f32 to vector<1x128xf32>
    %38 = arith.mulf %36, %37 : vector<1x128xf32>
    %39 = arith.mulf %33, %33 : vector<1x128xf32>
    %40 = arith.subf %38, %39 : vector<1x128xf32>
    %cst_18 = arith.constant 9.99999974E-6 : f32
    %41 = vector.broadcast %cst_18 : f32 to vector<1x128xf32>
    %42 = arith.addf %40, %41 : vector<1x128xf32>
    %43 = math.rsqrt %42 : vector<1x128xf32>
    %c0_19 = arith.constant 0 : index
    %c0_20 = arith.constant 0 : index
    %44 = vector.load %arg6[%c0_19, %c0_20] : memref<1x128xf32, #tpu.memory_space<vmem>>, vector<1x128xf32>
    %45 = arith.mulf %43, %44 : vector<1x128xf32>
    %c0_21 = arith.constant 0 : index
    %c0_22 = arith.constant 0 : index
    %46 = vector.load %arg8[%c0_21, %c0_22] : memref<1x128xf32, #tpu.memory_space<vmem>>, vector<1x128xf32>
    %47 = arith.mulf %46, %45 : vector<1x128xf32>
    %c0_23 = arith.constant 0 : index
    %c0_24 = arith.constant 0 : index
    %48 = vector.load %arg9[%c0_23, %c0_24] : memref<1x1xf32, #tpu.memory_space<vmem>>, vector<1x1xf32>
    %c0_25 = arith.constant 0 : index
    %c0_26 = arith.constant 0 : index
    %49 = vector.load %arg7[%c0_25, %c0_26] : memref<1x128xf32, #tpu.memory_space<vmem>>, vector<1x128xf32>
    %50 = arith.mulf %33, %45 : vector<1x128xf32>
    %51 = arith.subf %49, %50 : vector<1x128xf32>
    %52 = arith.mulf %46, %51 : vector<1x128xf32>
    %cst_27 = arith.constant dense<0.000000e+00> : vector<1xf32>
    %53 = vector.multi_reduction <add>, %52, %cst_27 [1] : vector<1x128xf32> to vector<1xf32>
    %54 = vector.shape_cast %53 : vector<1xf32> to vector<1x1xf32>
    %55 = arith.addf %48, %54 : vector<1x1xf32>
    %cst_28 = arith.constant dense<0.000000e+00> : vector<1x8xf32>
    %56 = tpu.matmul %47, %29, %cst_28 {dimension_numbers = #tpu.dot_dimension_numbers<[1], [1], [0], [0], [0, 0, 1, 0], [], []>} : vector<1x128xf32>, vector<8x128xf32>, vector<1x8xf32> -> vector<1x8xf32>
    %57 = vector.broadcast %55 : vector<1x1xf32> to vector<1x8xf32>
    %58 = arith.addf %56, %57 : vector<1x8xf32>
    %c0_29 = arith.constant 0 : index
    %c0_30 = arith.constant 0 : index
    %59 = vector.load %arg10[%c0_29, %c0_30] : memref<1x8xf32, #tpu.memory_space<vmem>>, vector<1x8xf32>
    tpu.vector_store %arg10[%c0_29, %c0_30], %58 {strides = array<i32>} : memref<1x8xf32, #tpu.memory_space<vmem>>, vector<1x8xf32>,
    return
  }
  func.func @transform_0(%arg0: i32) -> (i32, i32) {
    %c0_i32 = arith.constant 0 : i32
    %c0_i32_0 = arith.constant 0 : i32
    %c0_i32_1 = arith.constant 0 : i32
    return %c0_i32, %c0_i32_0 : i32, i32
  }
  func.func @transform_1(%arg0: i32) -> (i32, i32) {
    %c0_i32 = arith.constant 0 : i32
    %c0_i32_0 = arith.constant 0 : i32
    %c0_i32_1 = arith.constant 0 : i32
    return %c0_i32, %c0_i32_0 : i32, i32
  }
  func.func @transform_2(%arg0: i32) -> (i32, i32) {
    %c0_i32 = arith.constant 0 : i32
    %c0_i32_0 = arith.constant 0 : i32
    %c0_i32_1 = arith.constant 0 : i32
    return %c0_i32, %c0_i32_0 : i32, i32
  }
  func.func @transform_3(%arg0: i32) -> (i32, i32) {
    %c0_i32 = arith.constant 0 : i32
    %c0_i32_0 = arith.constant 0 : i32
    %c0_i32_1 = arith.constant 0 : i32
    return %c0_i32, %c0_i32_0 : i32, i32
  }
  func.func @transform_4(%arg0: i32) -> (i32, i32) {
    %c0_i32 = arith.constant 0 : i32
    %c0_i32_0 = arith.constant 0 : i32
    %c0_i32_1 = arith.constant 0 : i32
    return %c0_i32, %c0_i32_0 : i32, i32
  }
  func.func @transform_5(%arg0: i32) -> (i32, i32) {
    %c0_i32 = arith.constant 0 : i32
    %c0_i32_0 = arith.constant 0 : i32
    %c0_i32_1 = arith.constant 0 : i32
    return %c0_i32, %c0_i32_0 : i32, i32
  }
  func.func @transform_6(%arg0: i32) -> (i32, i32) {
    %c0_i32 = arith.constant 0 : i32
    %c0_i32_0 = arith.constant 0 : i32
    %c0_i32_1 = arith.constant 0 : i32
    return %c0_i32, %c0_i32_0 : i32, i32
  }
  func.func @transform_7(%arg0: i32) -> (i32, i32) {
    %c0_i32 = arith.constant 0 : i32
    %c0_i32_0 = arith.constant 0 : i32
    %c0_i32_1 = arith.constant 0 : i32
    return %c0_i32, %c0_i32_0 : i32, i32
  }
  func.func @transform_8(%arg0: i32) -> (i32, i32) {
    %c0_i32 = arith.constant 0 : i32
    %c0_i32_0 = arith.constant 0 : i32
    %c0_i32_1 = arith.constant 0 : i32
    return %c0_i32, %c0_i32_0 : i32, i32
  }
  func.func @transform_9(%arg0: i32) -> (i32, i32) {
    %c0_i32 = arith.constant 0 : i32
    %c0_i32_0 = arith.constant 0 : i32
    %c0_i32_1 = arith.constant 0 : i32
    return %c0_i32, %c0_i32_0 : i32, i32
  }
}

</mosaic_0001>

<bundles_post_ra>
// kernel: entity_color_forward.1
= control target key start
LH: loop header
LB: loop body
LE: loop exit
PB: predicated region body
PF: predicated region fallthrough
CT: control target
= control target key end

     0   :  { %s606_s0 = inlined_call_operand.hbm [shape: f32[8,128], index: 0, kind: input, shape index: {}]   ;;  %s607_s1 = inlined_call_operand.vmem [shape: f32[1,128], index: 1, kind: input, shape index: {}]   ;;  %s608_s2 = inlined_call_operand.vmem [shape: f32[1,128], index: 2, kind: input, shape index: {}]   ;;  %s609_s3 = inlined_call_operand.hbm [shape: bf16[128,128], index: 3, kind: input, shape index: {}]   ;;  %s610_s4 = inlined_call_operand.vmem [shape: f32[1,128], index: 4, kind: input, shape index: {}]   ;;  %s611_s5 = inlined_call_operand.vmem [shape: f32[1,128], index: 5, kind: input, shape index: {}]   ;;  %s612_s6 = inlined_call_operand.vmem [shape: f32[1,128], index: 6, kind: input, shape index: {}]   ;;  %s613_s7 = inlined_call_operand.vmem [shape: f32[1,128], index: 7, kind: input, shape index: {}]   ;;  %s614_s8 = inlined_call_operand.<no memory space> [shape: f32[1,1], index: 8, kind: input, shape index: {}]   ;;  %s615_s9 = inlined_call_operand.hbm [shape: f32[1,8], index: 9, kind: output, shape index: {}]  }
   0x1   :  { %v14_v0 = vstv %s614_s8 }
   0x2   :  { %15 = vst [vmem:[#allocation2] sm:$0x1] %v14_v0 }
   0x3   :  { %16 = vsyncpa [#allocation4], 0 }
   0x4   :  { %17 = vsyncpa [#allocation7], 0 }
   0x5   :  { %18 = vsyncpa [#allocation5], 0  ;;  %s479_s11 = smov [#allocation3]   ;;  %s480_s13 = smov [#allocation6]  }
   0x6   :  { %s25_s12 = sshll.u32 %s479_s11, 4  ;;  %s38_s14 = sshll.u32 %s480_s13, 4  ;;  %s26_s12 = int_to_ptr.vmem [resolvable:$true] %s25_s12  ;;  %s540_s14 = int_to_ptr.vmem [resolvable:$true] %s38_s14 }
   0x7   :  { %s407_s17 = scalar_lea.hbm %s606_s0, 128 }
   0x8   :  { %p408_p0 = scmp.ne.s32.totalorder %s606_s0, %s407_s17  ;;  %p411_p1 = scmp.lt.u32.totalorder %s407_s17, %s606_s0 }
   0xa   :  { %p413_p2 = pnand %p411_p1, %p408_p0 }
   0xc   :  { %416 = shalt.err (!%p413_p2)
}
   0xd   :  { %s417_s21 = scalar_lea.vmem %s26_s12, 128  ;;  %p422_p4 = scmp.lt.s32.totalorder %s26_s12, %s26_s12 }
   0xe   :  { %p418_p3 = scmp.ne.s32.totalorder %s26_s12, %s417_s21  ;;  %p423_p5 = scmp.lt.s32.totalorder %s417_s21, %s417_s21 }
  0x10   :  { %p424_p6 = por %p423_p5, %p422_p4 }
  0x12   :  { %p425_p7 = pnand %p424_p6, %p418_p3 }
  0x14   :  { %428 = shalt.err (!%p425_p7)
}
  0x15   :  { %28 = dma.hbm_to_vmem [thread:$0]  %s606_s0, 128, %s26_s12, [#allocation4]  }
  0x16   :  { %s429_s26 = scalar_lea.hbm %s609_s3, 1024 }
  0x17   :  { %p430_p8 = scmp.ne.s32.totalorder %s609_s3, %s429_s26  ;;  %p433_p9 = scmp.lt.u32.totalorder %s429_s26, %s609_s3 }
  0x19   :  { %p435_p10 = pnand %p433_p9, %p430_p8 }
  0x1b   :  { %438 = shalt.err (!%p435_p10)
}
  0x1c   :  { %s439_s10 = scalar_lea.vmem %s540_s14, 1024  ;;  %p444_p12 = scmp.lt.s32.totalorder %s540_s14, %s540_s14 }
  0x1d   :  { %p440_p11 = scmp.ne.s32.totalorder %s540_s14, %s439_s10  ;;  %p445_p13 = scmp.lt.s32.totalorder %s439_s10, %s439_s10 }
  0x1f   :  { %p446_p0 = por %p445_p13, %p444_p12 }
  0x21   :  { %p447_p1 = pnand %p446_p0, %p440_p11 }
  0x23   :  { %450 = shalt.err (!%p447_p1)
}
  0x24   :  { %s481_s0 = smov 64   ;;  %s482_s11 = smov 4  }
  0x25   :  { %44 = dma.hbm_to_vmem [thread:$0]  %s609_s3, 1024, %s540_s14, [#allocation7], %s481_s0, %s481_s0, %s482_s11  }
  0x26   :  { %473 = dma.done.wait [#allocation4], 128  }
  0x27   :  { %474 = vsyncadd [#allocation4], 4294967168 }
  0x28   :  { %475 = dma.done.wait [#allocation7], 1024  }
  0x29   :  { %476 = vsyncadd [#allocation7], 4294966272  ;;  %v483_v1 = vmov 0.0   ;;  %vm484_vm0 = vmmov 0   ;;  %v395_v2 = vld [vmem:[#allocation6] sm:$0xff]   ;;  %v396_v3 = vld [vmem:[#allocation6 + $0x8] sm:$0xff]   ;;  %v87_v29 = vlaneseq }
  0x2a   :  { %361 = vmatprep.subr.bf16.mxu0 %v483_v1  ;;  %377 = vmatprep.mubr.msk.bf16.mxu0 %vm484_vm0, %v483_v1  ;;  %v397_v4 = vld [vmem:[#allocation6 + $0x10] sm:$0xff]   ;;  %v62_v5 = vld [vmem:[#allocation3] sm:$0xff]  ;;  %v399_v13 = vld [vmem:[#allocation6 + $0x20] sm:$0xff]   ;;  %vm239_vm1 = vcmask 1040384   ;;  %vm323_vm2 = vcmask 57344  }
  0x2b   :  { %381 = vmatprep.subr.mxu1 %v483_v1  ;;  %383 = vmatprep.mubr.msk.f32.mxu1 %vm484_vm0, %v483_v1  ;;  %v63_v6 = vrot.slane %v62_v5, 4  ;;  %v70_v7 = vmul.f32 %v62_v5, %v62_v5  ;;  %v398_v8 = vld [vmem:[#allocation6 + $0x18] sm:$0xff]   ;;  %v400_v18 = vld [vmem:[#allocation6 + $0x28] sm:$0xff]   ;;  %v401_v23 = vld [vmem:[#allocation6 + $0x30] sm:$0xff]   ;;  %v88_v30 = vshrl.u32 %v87_v29, 7 }
  0x2c   :  { %362 = vmatpush3.bf16.msra.mxu0 %v395_v2  ;;  %v402_v27 = vld [vmem:[#allocation6 + $0x38] sm:$0xff]   ;;  %v82_v31 = vld [vmem:[%s607_s1] sm:$0x1] }
  0x2d   :  { %363 = vmatprep.subr.bf16.mxu0 %v483_v1  ;;  %v64_v9 = vadd.f32 %v63_v6, %v62_v5  ;;  %v71_v10 = vrot.slane %v70_v7, 4  ;;  %v574_v32 = vsub.s32 0, %v88_v30  ;;  %v84_v35 = vld [vmem:[%s608_s2] sm:$0x1] }
  0x2e   :  { %v341_v43 = vld [vmem:[%s610_s4] ss:$0 sm:$0xff] }
  0x2f   :  { %v65_v11 = vrot.slane %v64_v9, 2  ;;  %v72_v12 = vadd.f32 %v71_v10, %v70_v7  ;;  %v235_v7 = vld [vmem:[%s612_s6] sm:$0x1] }
  0x30   :  { %364 = vmatpush3.bf16.msra.mxu0 %v396_v3  ;;  %v230_v3 = vld [vmem:[%s611_s5] sm:$0x1]  ;;  %s486_s5 = smov [#allocation8]  }
  0x31   :  { %365 = vmatprep.subr.bf16.mxu0 %v483_v1  ;;  %v66_v14 = vadd.f32 %v65_v11, %v64_v9  ;;  %v73_v15 = vrot.slane %v72_v12, 2 }
  0x33   :  { %v67_v16 = vrot.slane %v66_v14, 1  ;;  %v74_v17 = vadd.f32 %v73_v15, %v72_v12 }
  0x34   :  { %366 = vmatpush3.bf16.msra.mxu0 %v397_v4 }
  0x35   :  { %367 = vmatprep.subr.bf16.mxu0 %v483_v1  ;;  %v68_v19 = vadd.f32 %v67_v16, %v66_v14  ;;  %v75_v20 = vrot.slane %v74_v17, 1  ;;  %v234_v14 = vld [vmem:[#allocation2] sm:$0x1] }
  0x37   :  { %v69_v21 = vmul.f32 0.125, %v68_v19  ;;  %v76_v22 = vadd.f32 %v75_v20, %v74_v17 }
  0x38   :  { %368 = vmatpush3.bf16.msra.mxu0 %v398_v8 }
  0x39   :  { %369 = vmatprep.subr.bf16.mxu0 %v483_v1  ;;  %v77_v24 = vmul.f32 0.125, %v76_v22  ;;  %v78_v25 = vmul.f32 %v69_v21, %v69_v21 }
  0x3b   :  { %v79_v26 = vsub.f32 %v77_v24, %v78_v25 }
  0x3c   :  { %370 = vmatpush3.bf16.msra.mxu0 %v399_v13  ;;  %v485_v13 = vmov 0  }
  0x3d   :  { %371 = vmatprep.subr.bf16.mxu0 %v483_v1  ;;  %v80_v28 = vadd.f32 1e-05, %v79_v26  ;;  %394 = vset.pattern.permute.xlu0 %v485_v13 }
  0x3f   :  { %403 = vrsqrt.f32 %v80_v28 }
  0x40   :  { %372 = vmatpush3.bf16.msra.mxu0 %v400_v18 }
  0x41   :  { %373 = vmatprep.subr.bf16.mxu0 %v483_v1 }
  0x44   :  { %374 = vmatpush3.bf16.msra.mxu0 %v401_v23 }
  0x45   :  { %375 = vmatprep.subr.bf16.mxu0 %v483_v1 }
  0x48   :  { %376 = vmatpush3.bf16.msra.mxu0 %v402_v27 }
  0x49   :  { %v404_v33 = vpop.eup %403 }
  0x4a   :  { %v83_v34 = vmul.f32 %v404_v33, %v82_v31 }
  0x4c   :  { %v85_v36 = vmul.f32 %v83_v34, %v69_v21  ;;  %v90_v37 = vrot.slane %v83_v34, %v574_v32 }
  0x4e   :  { %v86_v38 = vsub.f32 %v84_v35, %v85_v36  ;;  %v91_v39 = vmul.f32 %v90_v37, %v62_v5  ;;  %v232_v5 = vld [vmem:[%s613_s7] sm:$0x1]  ;;  %s331_s7 = sshll.u32 %s486_s5, 4  ;;  %s332_s7 = int_to_ptr.vmem [resolvable:$true] %s331_s7 }
  0x4f   :  { %s451_s6 = scalar_lea.vmem %s332_s7, 16  ;;  %s455_s21 = scalar_lea.vmem %s332_s7, 32 }
  0x50   :  { %v96_v40 = vrot.slane %v86_v38, %v574_v32  ;;  %p452_p2 = scmp.ne.s32.totalorder %s332_s7, %s451_s6  ;;  %p456_p3 = scmp.lt.s32.totalorder %s332_s7, %s332_s7 }
  0x51   :  { %p457_p4 = scmp.lt.s32.totalorder %s455_s21, %s451_s6 }
  0x52   :  { %v98_v41 = vadd.f32 %v96_v40, %v91_v39 }
  0x53   :  { %p458_p5 = por %p457_p4, %p456_p3 }
  0x54   :  { %v99_v42 = vpack.c.bf16 %v98_v41, %v98_v41 }
  0x55   :  { %p459_p6 = pnand %p458_p5, %p452_p2 }
  0x56   :  { %378 = vmatmul.mubr.bf16.vlgmr.msra.gmra.mrb[0].mxu0 %v99_v42 }
 0x129   :  { %v205_v44 = vpop.f32.mrb[0].mxu0 }
 0x12a   :  { %v206_v45 = vadd.f32 %v341_v43, %v205_v44  ;;  %v379_v46 = vpop.f32.mrb[1].mxu0 }
 0x12b   :  { %v208_v47 = vpop.f32.mrb[2].mxu0 }
 0x12c   :  { %v211_v48 = vrot.slane %v206_v45, 4  ;;  %v218_v49 = vmul.f32 %v206_v45, %v206_v45  ;;  %v380_v50 = vpop.f32.mrb[3].mxu0  ;;  %382 = vmatpush3.xpose.msra.mxu1 %v206_v45 }
 0x12e   :  { %v212_v51 = vadd.f32 %v211_v48, %v206_v45  ;;  %v219_v52 = vrot.slane %v218_v49, 4 }
 0x130   :  { %v213_v53 = vrot.slane %v212_v51, 2  ;;  %v220_v54 = vadd.f32 %v219_v52, %v218_v49 }
 0x132   :  { %v214_v55 = vadd.f32 %v213_v53, %v212_v51  ;;  %v221_v56 = vrot.slane %v220_v54, 2 }
 0x134   :  { %v215_v57 = vrot.slane %v214_v55, 1  ;;  %v222_v58 = vadd.f32 %v221_v56, %v220_v54 }
 0x136   :  { %v216_v59 = vadd.f32 %v215_v57, %v214_v55  ;;  %v223_v60 = vrot.slane %v222_v58, 1 }
 0x138   :  { %v217_v61 = vmul.f32 0.125, %v216_v59  ;;  %v224_v62 = vadd.f32 %v223_v60, %v222_v58 }
 0x13a   :  { %v225_v63 = vmul.f32 0.125, %v224_v62  ;;  %v226_v0 = vmul.f32 %v217_v61, %v217_v61 }
 0x13c   :  { %v227_v1 = vsub.f32 %v225_v63, %v226_v0 }
 0x13e   :  { %v228_v2 = vadd.f32 1e-05, %v227_v1 }
 0x140   :  { %405 = vrsqrt.f32 %v228_v2 }
 0x14a   :  { %v406_v4 = vpop.eup %405 }
 0x14b   :  { %v231_v6 = vmul.f32 %v406_v4, %v230_v3 }
 0x14d   :  { %v233_v8 = vmul.f32 %v232_v5, %v231_v6  ;;  %v236_v9 = vmul.f32 %v231_v6, %v217_v61 }
 0x14f   :  { %384 = vmatmul.mubr.f32.vlgmr.msra.gmra.mrb[0].mxu1 %v233_v8  ;;  %v237_v10 = vsub.f32 %v235_v7, %v236_v9 }
 0x151   :  { %v238_v11 = vmul.f32 %v237_v10, %v232_v5 }
 0x153   :  { %v240_v12 = vsel %vm239_vm1, %v238_v11, 0.0 }
 0x154   :  { %241 = vadd.xlane.f32.xlu0 %v240_v12 }
 0x1e1   :  { %v242_v15 = vpop.xlane.xlu0 %241 }
 0x1e2   :  { %v243_v16 = vadd.f32 %v242_v15, %v234_v14 }
 0x1e4   :  { %246 = vperm.xlu0 %394, %v243_v16  }
 0x222   :  { %v319_v17 = vpop.f32.mrb[0].mxu1 }
 0x223   :  { %v385_v18 = vpop.f32.mrb[1].mxu1 }
 0x263   :  { %v247_v19 = vpop.permute.xlu0 %246 }
 0x264   :  { %v252_v20 = vrot.slane %v247_v19, %v574_v32 }
 0x266   :  { %v320_v21 = vadd.f32 %v319_v17, %v252_v20 }
 0x268   :  { %324 = vst.msk [vmem:[#allocation8] sm:$0x1] %vm323_vm2, %v320_v21 }
 0x269   :  { %462 = shalt.err (!%p459_p6)
}
 0x26a   :  { %s463_s24 = scalar_lea.hbm %s615_s9, 16 }
 0x26b   :  { %p464_p7 = scmp.ne.s32.totalorder %s615_s9, %s463_s24  ;;  %p467_p8 = scmp.lt.u32.totalorder %s463_s24, %s615_s9 }
 0x26d   :  { %p469_p9 = pnand %p467_p8, %p464_p7 }
 0x26f   :  { %472 = shalt.err (!%p469_p9)
}
 0x270   :  { %334 = dma.vmem_to_hbm [thread:$0]  %s332_s7, 16, %s615_s9, [#allocation5]  }
 0x271   :  { %477 = dma.done.wait [#allocation5], 16  }
 0x272   :  { %478 = vsyncadd [#allocation5], 4294967280 }
 0x273   :  { %338 = vsyncpa [#allocation4], 1 }
 0x274   :  { %339 = vsyncpa [#allocation7], 1 }
 0x275   :  { %340 = vsyncpa [#allocation5], 1 }

</bundles_post_ra>
